<compile_context>
chip_gen: v6e
topology: v6e:2x2x1
jax: 0.10.0
libtpu: 0.0.40
codegen_flags: <defaults>
</compile_context>

<pallas_src>
import jax
import jax.numpy as jnp
from jax.experimental import pallas as pl
from jax.experimental.pallas import tpu as pltpu


def _round_up(x, m):
    return ((x + m - 1) // m) * m


# ----------------------------------------------------------------------------
# Kernel
# ----------------------------------------------------------------------------
def _make_fused_kernel(num_layers):
    """Fused two-head MLP over one row tile.

    Ref order:
      x,
      w0, b0,                                   # layer 0 (column-concat, shared x)
      (w_cls_i, w_bbox_i, b_cls_i, b_bbox_i)*   # hidden layers 1..L-2 (per head)
      w_cls_last, w_bbox_last, b_last,          # final layer -> output slab
      out
    Weights bf16 (MXU path), biases f32, bias+ReLU on the VPU in f32.
    """

    def kernel(*refs):
        x_ref = refs[0]
        out_ref = refs[-1]
        p = refs[1:-1]

        x = x_ref[...]  # bf16

        if num_layers == 1:
            # Single Linear per head, both mapped into the output slab.
            y = jnp.dot(x, p[0][...], preferred_element_type=jnp.float32) + p[1][...]
            out_ref[...] = y.astype(out_ref.dtype)
            return

        # ---- Layer 0: one full-width matmul on the shared input. ----
        h0 = jnp.dot(x, p[0][...], preferred_element_type=jnp.float32) + p[1][...]
        h0 = jnp.maximum(h0, 0.0)
        half = p[0].shape[1] // 2                 # 128-aligned split point
        h_c = h0[:, :half].astype(jnp.bfloat16)   # cls-head activations
        h_b = h0[:, half:].astype(jnp.bfloat16)   # bbox-head activations

        idx = 2
        # ---- Hidden layers: two half-width dots (no block-diag zero FLOPs). --
        for _ in range(1, num_layers - 1):
            wc = p[idx][...]
            wb = p[idx + 1][...]
            bc = p[idx + 2][...]
            bb = p[idx + 3][...]
            idx += 4
            h_c = jnp.maximum(
                jnp.dot(h_c, wc, preferred_element_type=jnp.float32) + bc, 0.0
            ).astype(jnp.bfloat16)
            h_b = jnp.maximum(
                jnp.dot(h_b, wb, preferred_element_type=jnp.float32) + bb, 0.0
            ).astype(jnp.bfloat16)

        # ---- Final layer: disjoint columns of one lane-dense output slab. ----
        wc = p[idx][...]
        wb = p[idx + 1][...]
        bl = p[idx + 2][...]
        y = (jnp.dot(h_c, wc, preferred_element_type=jnp.float32)
             + jnp.dot(h_b, wb, preferred_element_type=jnp.float32)
             + bl)
        out_ref[...] = y.astype(out_ref.dtype)

    return kernel


# ----------------------------------------------------------------------------
# Fused, padded parameter construction (done once at init)
# ----------------------------------------------------------------------------
def _build_fused_params(cls_w, cls_b, bbox_w, bbox_b, num_classes, w_dtype):
    """Layer 0: column-concat (shared x).  Hidden layers: separate per-head
    weights (no zero block-diag).  Final layer: per-head weights mapped into
    disjoint columns of one >=128-wide output slab."""
    num_layers = len(cls_w)
    out_pad = _round_up(num_classes + 4, 128)
    params = []

    f = cls_w[0].shape[0]
    f_pad = _round_up(f, 128)

    if num_layers == 1:
        w0 = jnp.zeros((f_pad, out_pad), jnp.float32)
        w0 = w0.at[:f, :num_classes].set(cls_w[0])
        w0 = w0.at[:f, num_classes:num_classes + 4].set(bbox_w[0])
        b0 = jnp.zeros((1, out_pad), jnp.float32)
        b0 = b0.at[0, :num_classes].set(cls_b[0])
        b0 = b0.at[0, num_classes:num_classes + 4].set(bbox_b[0])
        params += [w0.astype(w_dtype), b0]
        return params, f_pad, out_pad

    # Layer 0: shared input, column-concat of both heads' first weights.
    h1 = cls_w[0].shape[1]
    h1_pad = _round_up(h1, 128)
    w0 = jnp.zeros((f_pad, 2 * h1_pad), jnp.float32)
    w0 = w0.at[:f, :h1].set(cls_w[0])
    w0 = w0.at[:f, h1_pad:h1_pad + h1].set(bbox_w[0])
    b0 = jnp.zeros((1, 2 * h1_pad), jnp.float32)
    b0 = b0.at[0, :h1].set(cls_b[0])
    b0 = b0.at[0, h1_pad:h1_pad + h1].set(bbox_b[0])
    params += [w0.astype(w_dtype), b0]

    # Hidden layers 1..L-2: separate per-head weights/biases.
    for li in range(1, num_layers - 1):
        cin, cout = cls_w[li].shape
        cin_pad, cout_pad = _round_up(cin, 128), _round_up(cout, 128)
        wc = jnp.zeros((cin_pad, cout_pad), jnp.float32).at[:cin, :cout].set(cls_w[li])
        wb = jnp.zeros((cin_pad, cout_pad), jnp.float32).at[:cin, :cout].set(bbox_w[li])
        bc = jnp.zeros((1, cout_pad), jnp.float32).at[0, :cout].set(cls_b[li])
        bb = jnp.zeros((1, cout_pad), jnp.float32).at[0, :cout].set(bbox_b[li])
        params += [wc.astype(w_dtype), wb.astype(w_dtype), bc, bb]

    # Final layer: both heads into disjoint columns of the output slab.
    li = num_layers - 1
    cin = cls_w[li].shape[0]
    cin_pad = _round_up(cin, 128)
    wc = jnp.zeros((cin_pad, out_pad), jnp.float32)
    wc = wc.at[:cin, :num_classes].set(cls_w[li])
    wb = jnp.zeros((cin_pad, out_pad), jnp.float32)
    wb = wb.at[:cin, num_classes:num_classes + 4].set(bbox_w[li])
    bl = jnp.zeros((1, out_pad), jnp.float32)
    bl = bl.at[0, :num_classes].set(cls_b[li])
    bl = bl.at[0, num_classes:num_classes + 4].set(bbox_b[li])
    params += [wc.astype(w_dtype), wb.astype(w_dtype), bl]

    return params, f_pad, out_pad


# ----------------------------------------------------------------------------
# Forward wrapper (single pallas_call for both heads)
# ----------------------------------------------------------------------------
def fused_boxhead_forward(x, params, num_layers, num_classes, f_pad, out_pad,
                          *, tm=256):
    """Returns (logits [N, num_classes], bbox [N, 4])."""
    n, f = x.shape
    ROW = 16  # bf16 sublane packing granularity for the x tile

    n_al = _round_up(max(n, 1), ROW)
    tm_eff = min(_round_up(tm, ROW), n_al)
    # Force >= 2 row tiles when possible so the 'parallel' axis can actually
    # shard across v7x's two TensorCores (free on v5e/v6e).
    if (n_al + tm_eff - 1) // tm_eff < 2 and n_al >= 2 * ROW:
        tm_eff = _round_up((n_al + 1) // 2, ROW)
    n_pad = _round_up(n_al, tm_eff)
    grid = (n_pad // tm_eff,)

    # Single fused pad + cast to bf16 (halves x HBM->VMEM traffic; x is
    # consumed in bf16 by the MXU anyway).
    x_bf = x.astype(jnp.bfloat16)
    if (n_pad, f_pad) != (n, f):
        x_bf = jnp.pad(x_bf, ((0, n_pad - n), (0, f_pad - f)))

    # Explicit VMEM budget: single-buffered weights + double-buffered x/out
    # tiles + f32 intermediates, with headroom.
    param_bytes = int(sum(int(p.size) * p.dtype.itemsize for p in params))
    widest = max(int(p.shape[-1]) for p in params)
    needed = (param_bytes
              + 2 * tm_eff * f_pad * 2        # x tile, bf16, double-buffered
              + 2 * tm_eff * out_pad * 4      # out tile, f32, double-buffered
              + 4 * tm_eff * widest * 4       # live intermediates
              + (4 << 20))                    # headroom
    vmem_limit = int(min(max(needed, 32 << 20), 120 << 20))

    kernel = _make_fused_kernel(num_layers)
    out_shape = jax.ShapeDtypeStruct((n_pad, out_pad), jnp.float32)
    x_spec = pl.BlockSpec((tm_eff, f_pad), lambda i: (i, 0))
    out_spec = pl.BlockSpec((tm_eff, out_pad), lambda i: (i, 0))
    cparams = pltpu.CompilerParams(dimension_semantics=("parallel",),
                                   vmem_limit_bytes=vmem_limit)

    def run(single_buffer_weights):
        in_specs = [x_spec]
        for prm in params:
            kwargs = {}
            if single_buffer_weights:
                # Grid-invariant -> fetched once; don't pay 2x VMEM for them.
                kwargs["pipeline_mode"] = pl.Buffered(1)
            in_specs.append(pl.BlockSpec(prm.shape, lambda i: (0, 0), **kwargs))
        return pl.pallas_call(
            kernel,
            out_shape=out_shape,
            grid=grid,
            in_specs=in_specs,
            out_specs=out_spec,
            compiler_params=cparams,
        )(x_bf, *params)

    try:
        out = run(True)
    except Exception:  # pragma: no cover — fall back if Buffered(1) unsupported
        out = run(False)

    logits = out[:n, :num_classes]
    bbox = out[:n, num_classes:num_classes + 4]
    return logits, bbox


# ----------------------------------------------------------------------------
# Module mirror
# ----------------------------------------------------------------------------
class BoxHeadPallas:
    """Mirror of the PyTorch BoxHead: two parallel MLP heads sharing the input."""

    def __init__(self, lengths, num_classes, key, weight_dtype=jnp.bfloat16):
        self.lengths = list(lengths)
        self.num_classes = num_classes
        self.num_layers = len(self.lengths)  # (L-1) hidden Linears + 1 final

        dims_hidden = list(zip(self.lengths[:-1], self.lengths[1:]))

        def init_head(key, final_out):
            dims = dims_hidden + [(self.lengths[-1], final_out)]
            ws, bs = [], []
            for din, dout in dims:
                key, kw, kb = jax.random.split(key, 3)
                bound = 1.0 / float(din) ** 0.5  # torch-Linear-like scale
                ws.append(jax.random.uniform(kw, (din, dout), jnp.float32,
                                             minval=-bound, maxval=bound))
                bs.append(jax.random.uniform(kb, (dout,), jnp.float32,
                                             minval=-bound, maxval=bound))
            return ws, bs, key

        # Unpadded f32 params (kept for the reference check / export).
        self.cls_w, self.cls_b, key = init_head(key, num_classes)
        self.bbox_w, self.bbox_b, key = init_head(key, 4)
        self.num_layers = len(self.cls_w)

        # Fused, lane-padded, bf16 parameters used by the kernel.
        self.params, self.f_pad, self.out_pad = _build_fused_params(
            self.cls_w, self.cls_b, self.bbox_w, self.bbox_b,
            num_classes, weight_dtype)

    def __call__(self, x, tm=256):
        return fused_boxhead_forward(x, self.params, self.num_layers,
                                     self.num_classes, self.f_pad,
                                     self.out_pad, tm=tm)


# ----------------------------------------------------------------------------
# Pure-JAX reference (f32, per-head) for correctness checking
# ----------------------------------------------------------------------------
def _reference_head(x, ws, bs):
    h = x
    for i, (w, b) in enumerate(zip(ws, bs)):
        h = h @ w + b
        if i < len(ws) - 1:
            h = jnp.maximum(h, 0.0)
    return h


if __name__ == "__main__":
    key = jax.random.PRNGKey(0)
    key, kx, kparams = jax.random.split(key, 3)

    # Small shapes consistent with the module's forward (x: [num_rois, lengths[0]]).
    lengths = [32, 64, 32]
    num_classes = 6
    n_rois = 8

    x = jax.random.normal(kx, (n_rois, lengths[0]), jnp.float32)

    model = BoxHeadPallas(lengths, num_classes, kparams)
    logits, bbox = model(x)
    jax.block_until_ready((logits, bbox))

    ref_logits = _reference_head(x, model.cls_w, model.cls_b)
    ref_bbox = _reference_head(x, model.bbox_w, model.bbox_b)

    assert logits.shape == (n_rois, num_classes)
    assert bbox.shape == (n_rois, 4)
    # Weights and activations feed the MXU in bf16 (f32 accumulate), so compare
    # against the pure-f32 reference with a bf16-appropriate tolerance.
    assert jnp.allclose(logits, ref_logits, atol=5e-2, rtol=5e-2)
    assert jnp.allclose(bbox, ref_bbox, atol=5e-2, rtol=5e-2)

    print("KERNEL_OK")
</pallas_src>

<mosaic_0001>
module attributes {stable_mosaic.version = 11 : i64} {
  func.func @kernel(%arg0: i32, %arg1: memref<16x128xbf16, #tpu.memory_space<vmem>>, %arg2: memref<128x256xbf16, #tpu.memory_space<vmem>>, %arg3: memref<1x256xf32, #tpu.memory_space<vmem>>, %arg4: memref<128x128xbf16, #tpu.memory_space<vmem>>, %arg5: memref<128x128xbf16, #tpu.memory_space<vmem>>, %arg6: memref<1x128xf32, #tpu.memory_space<vmem>>, %arg7: memref<1x128xf32, #tpu.memory_space<vmem>>, %arg8: memref<128x128xbf16, #tpu.memory_space<vmem>>, %arg9: memref<128x128xbf16, #tpu.memory_space<vmem>>, %arg10: memref<1x128xf32, #tpu.memory_space<vmem>>, %arg11: memref<16x128xf32, #tpu.memory_space<vmem>>) attributes {dimension_semantics = [#tpu.dimension_semantics<parallel>], iteration_bounds = array<i64: 1>, scalar_prefetch = 0 : i64, scratch_operands = 0 : i64, tpu.core_type = #tpu.core_type<tc>, window_params = [{transform_indices = @transform_0, window_bounds = array<i64: 16, 128>}, {pipeline_mode = #tpu.pipeline_mode<synchronous>, transform_indices = @transform_1, window_bounds = array<i64: 128, 256>}, {pipeline_mode = #tpu.pipeline_mode<synchronous>, transform_indices = @transform_2, window_bounds = array<i64: 1, 256>}, {pipeline_mode = #tpu.pipeline_mode<synchronous>, transform_indices = @transform_3, window_bounds = array<i64: 128, 128>}, {pipeline_mode = #tpu.pipeline_mode<synchronous>, transform_indices = @transform_4, window_bounds = array<i64: 128, 128>}, {pipeline_mode = #tpu.pipeline_mode<synchronous>, transform_indices = @transform_5, window_bounds = array<i64: 1, 128>}, {pipeline_mode = #tpu.pipeline_mode<synchronous>, transform_indices = @transform_6, window_bounds = array<i64: 1, 128>}, {pipeline_mode = #tpu.pipeline_mode<synchronous>, transform_indices = @transform_7, window_bounds = array<i64: 128, 128>}, {pipeline_mode = #tpu.pipeline_mode<synchronous>, transform_indices = @transform_8, window_bounds = array<i64: 128, 128>}, {pipeline_mode = #tpu.pipeline_mode<synchronous>, transform_indices = @transform_9, window_bounds = array<i64: 1, 128>}, {transform_indices = @transform_10, window_bounds = array<i64: 16, 128>}]} {
    %c0 = arith.constant 0 : index
    %c0_0 = arith.constant 0 : index
    %0 = vector.load %arg1[%c0, %c0_0] : memref<16x128xbf16, #tpu.memory_space<vmem>>, vector<16x128xbf16>
    %c0_1 = arith.constant 0 : index
    %c0_2 = arith.constant 0 : index
    %1 = vector.load %arg2[%c0_1, %c0_2] : memref<128x256xbf16, #tpu.memory_space<vmem>>, vector<128x256xbf16>
    %cst = arith.constant dense<0.000000e+00> : vector<16x256xf32>
    %2 = tpu.matmul %0, %1, %cst {dimension_numbers = #tpu.dot_dimension_numbers<[1], [0], [0], [1], [0, 0, 1, 1], [], []>} : vector<16x128xbf16>, vector<128x256xbf16>, vector<16x256xf32> -> vector<16x256xf32>
    %c0_3 = arith.constant 0 : index
    %c0_4 = arith.constant 0 : index
    %3 = vector.load %arg3[%c0_3, %c0_4] : memref<1x256xf32, #tpu.memory_space<vmem>>, vector<1x256xf32>
    %4 = vector.broadcast %3 : vector<1x256xf32> to vector<16x256xf32>
    %5 = arith.addf %2, %4 : vector<16x256xf32>
    %cst_5 = arith.constant 0.000000e+00 : f32
    %6 = vector.broadcast %cst_5 : f32 to vector<16x256xf32>
    %7 = arith.maximumf %5, %6 : vector<16x256xf32>
    %8 = vector.extract_strided_slice %7 {offsets = [0, 0], sizes = [16, 128], strides = [1, 1]} : vector<16x256xf32> to vector<16x128xf32>
    %9 = arith.truncf %8 : vector<16x128xf32> to vector<16x128xbf16>
    %10 = vector.extract_strided_slice %7 {offsets = [0, 128], sizes = [16, 128], strides = [1, 1]} : vector<16x256xf32> to vector<16x128xf32>
    %11 = arith.truncf %10 : vector<16x128xf32> to vector<16x128xbf16>
    %c0_6 = arith.constant 0 : index
    %c0_7 = arith.constant 0 : index
    %12 = vector.load %arg4[%c0_6, %c0_7] : memref<128x128xbf16, #tpu.memory_space<vmem>>, vector<128x128xbf16>
    %c0_8 = arith.constant 0 : index
    %c0_9 = arith.constant 0 : index
    %13 = vector.load %arg5[%c0_8, %c0_9] : memref<128x128xbf16, #tpu.memory_space<vmem>>, vector<128x128xbf16>
    %c0_10 = arith.constant 0 : index
    %c0_11 = arith.constant 0 : index
    %14 = vector.load %arg6[%c0_10, %c0_11] : memref<1x128xf32, #tpu.memory_space<vmem>>, vector<1x128xf32>
    %c0_12 = arith.constant 0 : index
    %c0_13 = arith.constant 0 : index
    %15 = vector.load %arg7[%c0_12, %c0_13] : memref<1x128xf32, #tpu.memory_space<vmem>>, vector<1x128xf32>
    %cst_14 = arith.constant dense<0.000000e+00> : vector<16x128xf32>
    %16 = tpu.matmul %9, %12, %cst_14 {dimension_numbers = #tpu.dot_dimension_numbers<[1], [0], [0], [1], [0, 0, 1, 1], [], []>} : vector<16x128xbf16>, vector<128x128xbf16>, vector<16x128xf32> -> vector<16x128xf32>
    %17 = vector.broadcast %14 : vector<1x128xf32> to vector<16x128xf32>
    %18 = arith.addf %16, %17 : vector<16x128xf32>
    %cst_15 = arith.constant 0.000000e+00 : f32
    %19 = vector.broadcast %cst_15 : f32 to vector<16x128xf32>
    %20 = arith.maximumf %18, %19 : vector<16x128xf32>
    %21 = arith.truncf %20 : vector<16x128xf32> to vector<16x128xbf16>
    %cst_16 = arith.constant dense<0.000000e+00> : vector<16x128xf32>
    %22 = tpu.matmul %11, %13, %cst_16 {dimension_numbers = #tpu.dot_dimension_numbers<[1], [0], [0], [1], [0, 0, 1, 1], [], []>} : vector<16x128xbf16>, vector<128x128xbf16>, vector<16x128xf32> -> vector<16x128xf32>
    %23 = vector.broadcast %15 : vector<1x128xf32> to vector<16x128xf32>
    %24 = arith.addf %22, %23 : vector<16x128xf32>
    %cst_17 = arith.constant 0.000000e+00 : f32
    %25 = vector.broadcast %cst_17 : f32 to vector<16x128xf32>
    %26 = arith.maximumf %24, %25 : vector<16x128xf32>
    %27 = arith.truncf %26 : vector<16x128xf32> to vector<16x128xbf16>
    %c0_18 = arith.constant 0 : index
    %c0_19 = arith.constant 0 : index
    %28 = vector.load %arg8[%c0_18, %c0_19] : memref<128x128xbf16, #tpu.memory_space<vmem>>, vector<128x128xbf16>
    %c0_20 = arith.constant 0 : index
    %c0_21 = arith.constant 0 : index
    %29 = vector.load %arg9[%c0_20, %c0_21] : memref<128x128xbf16, #tpu.memory_space<vmem>>, vector<128x128xbf16>
    %c0_22 = arith.constant 0 : index
    %c0_23 = arith.constant 0 : index
    %30 = vector.load %arg10[%c0_22, %c0_23] : memref<1x128xf32, #tpu.memory_space<vmem>>, vector<1x128xf32>
    %cst_24 = arith.constant dense<0.000000e+00> : vector<16x128xf32>
    %31 = tpu.matmul %21, %28, %cst_24 {dimension_numbers = #tpu.dot_dimension_numbers<[1], [0], [0], [1], [0, 0, 1, 1], [], []>} : vector<16x128xbf16>, vector<128x128xbf16>, vector<16x128xf32> -> vector<16x128xf32>
    %cst_25 = arith.constant dense<0.000000e+00> : vector<16x128xf32>
    %32 = tpu.matmul %27, %29, %cst_25 {dimension_numbers = #tpu.dot_dimension_numbers<[1], [0], [0], [1], [0, 0, 1, 1], [], []>} : vector<16x128xbf16>, vector<128x128xbf16>, vector<16x128xf32> -> vector<16x128xf32>
    %33 = arith.addf %31, %32 : vector<16x128xf32>
    %34 = vector.broadcast %30 : vector<1x128xf32> to vector<16x128xf32>
    %35 = arith.addf %33, %34 : vector<16x128xf32>
    %c0_26 = arith.constant 0 : index
    %c0_27 = arith.constant 0 : index
    %36 = vector.load %arg11[%c0_26, %c0_27] : memref<16x128xf32, #tpu.memory_space<vmem>>, vector<16x128xf32>
    tpu.vector_store %arg11[%c0_26, %c0_27], %35 {strides = array<i32>} : memref<16x128xf32, #tpu.memory_space<vmem>>, vector<16x128xf32>,
    return
  }
  func.func @transform_0(%arg0: i32) -> (i32, i32) {
    %c0_i32 = arith.constant 0 : i32
    %c0_i32_0 = arith.constant 0 : i32
    return %arg0, %c0_i32 : i32, i32
  }
  func.func @transform_1(%arg0: i32) -> (i32, i32) {
    %c0_i32 = arith.constant 0 : i32
    %c0_i32_0 = arith.constant 0 : i32
    %c0_i32_1 = arith.constant 0 : i32
    return %c0_i32, %c0_i32_0 : i32, i32
  }
  func.func @transform_2(%arg0: i32) -> (i32, i32) {
    %c0_i32 = arith.constant 0 : i32
    %c0_i32_0 = arith.constant 0 : i32
    %c0_i32_1 = arith.constant 0 : i32
    return %c0_i32, %c0_i32_0 : i32, i32
  }
  func.func @transform_3(%arg0: i32) -> (i32, i32) {
    %c0_i32 = arith.constant 0 : i32
    %c0_i32_0 = arith.constant 0 : i32
    %c0_i32_1 = arith.constant 0 : i32
    return %c0_i32, %c0_i32_0 : i32, i32
  }
  func.func @transform_4(%arg0: i32) -> (i32, i32) {
    %c0_i32 = arith.constant 0 : i32
    %c0_i32_0 = arith.constant 0 : i32
    %c0_i32_1 = arith.constant 0 : i32
    return %c0_i32, %c0_i32_0 : i32, i32
  }
  func.func @transform_5(%arg0: i32) -> (i32, i32) {
    %c0_i32 = arith.constant 0 : i32
    %c0_i32_0 = arith.constant 0 : i32
    %c0_i32_1 = arith.constant 0 : i32
    return %c0_i32, %c0_i32_0 : i32, i32
  }
  func.func @transform_6(%arg0: i32) -> (i32, i32) {
    %c0_i32 = arith.constant 0 : i32
    %c0_i32_0 = arith.constant 0 : i32
    %c0_i32_1 = arith.constant 0 : i32
    return %c0_i32, %c0_i32_0 : i32, i32
  }
  func.func @transform_7(%arg0: i32) -> (i32, i32) {
    %c0_i32 = arith.constant 0 : i32
    %c0_i32_0 = arith.constant 0 : i32
    %c0_i32_1 = arith.constant 0 : i32
    return %c0_i32, %c0_i32_0 : i32, i32
  }
  func.func @transform_8(%arg0: i32) -> (i32, i32) {
    %c0_i32 = arith.constant 0 : i32
    %c0_i32_0 = arith.constant 0 : i32
    %c0_i32_1 = arith.constant 0 : i32
    return %c0_i32, %c0_i32_0 : i32, i32
  }
  func.func @transform_9(%arg0: i32) -> (i32, i32) {
    %c0_i32 = arith.constant 0 : i32
    %c0_i32_0 = arith.constant 0 : i32
    %c0_i32_1 = arith.constant 0 : i32
    return %c0_i32, %c0_i32_0 : i32, i32
  }
  func.func @transform_10(%arg0: i32) -> (i32, i32) {
    %c0_i32 = arith.constant 0 : i32
    %c0_i32_0 = arith.constant 0 : i32
    return %arg0, %c0_i32 : i32, i32
  }
}

module attributes {stable_mosaic.version = 11 : i64} {
  func.func @kernel(%arg0: i32, %arg1: memref<16x128xbf16, #tpu.memory_space<vmem>>, %arg2: memref<128x256xbf16, #tpu.memory_space<vmem>>, %arg3: memref<1x256xf32, #tpu.memory_space<vmem>>, %arg4: memref<128x128xbf16, #tpu.memory_space<vmem>>, %arg5: memref<128x128xbf16, #tpu.memory_space<vmem>>, %arg6: memref<1x128xf32, #tpu.memory_space<vmem>>, %arg7: memref<1x128xf32, #tpu.memory_space<vmem>>, %arg8: memref<128x128xbf16, #tpu.memory_space<vmem>>, %arg9: memref<128x128xbf16, #tpu.memory_space<vmem>>, %arg10: memref<1x128xf32, #tpu.memory_space<vmem>>, %arg11: memref<16x128xf32, #tpu.memory_space<vmem>>) attributes {dimension_semantics = [#tpu.dimension_semantics<parallel>], iteration_bounds = array<i64: 1>, scalar_prefetch = 0 : i64, scratch_operands = 0 : i64, tpu.core_type = #tpu.core_type<tc>, window_params = [{transform_indices = @transform_0, window_bounds = array<i64: 16, 128>}, {pipeline_mode = #tpu.pipeline_mode<synchronous>, transform_indices = @transform_1, window_bounds = array<i64: 128, 256>}, {pipeline_mode = #tpu.pipeline_mode<synchronous>, transform_indices = @transform_2, window_bounds = array<i64: 1, 256>}, {pipeline_mode = #tpu.pipeline_mode<synchronous>, transform_indices = @transform_3, window_bounds = array<i64: 128, 128>}, {pipeline_mode = #tpu.pipeline_mode<synchronous>, transform_indices = @transform_4, window_bounds = array<i64: 128, 128>}, {pipeline_mode = #tpu.pipeline_mode<synchronous>, transform_indices = @transform_5, window_bounds = array<i64: 1, 128>}, {pipeline_mode = #tpu.pipeline_mode<synchronous>, transform_indices = @transform_6, window_bounds = array<i64: 1, 128>}, {pipeline_mode = #tpu.pipeline_mode<synchronous>, transform_indices = @transform_7, window_bounds = array<i64: 128, 128>}, {pipeline_mode = #tpu.pipeline_mode<synchronous>, transform_indices = @transform_8, window_bounds = array<i64: 128, 128>}, {pipeline_mode = #tpu.pipeline_mode<synchronous>, transform_indices = @transform_9, window_bounds = array<i64: 1, 128>}, {transform_indices = @transform_10, window_bounds = array<i64: 16, 128>}]} {
    %c0 = arith.constant 0 : index
    %c0_0 = arith.constant 0 : index
    %0 = vector.load %arg1[%c0, %c0_0] : memref<16x128xbf16, #tpu.memory_space<vmem>>, vector<16x128xbf16>
    %c0_1 = arith.constant 0 : index
    %c0_2 = arith.constant 0 : index
    %1 = vector.load %arg2[%c0_1, %c0_2] : memref<128x256xbf16, #tpu.memory_space<vmem>>, vector<128x256xbf16>
    %cst = arith.constant dense<0.000000e+00> : vector<16x256xf32>
    %2 = tpu.matmul %0, %1, %cst {dimension_numbers = #tpu.dot_dimension_numbers<[1], [0], [0], [1], [0, 0, 1, 1], [], []>} : vector<16x128xbf16>, vector<128x256xbf16>, vector<16x256xf32> -> vector<16x256xf32>
    %c0_3 = arith.constant 0 : index
    %c0_4 = arith.constant 0 : index
    %3 = vector.load %arg3[%c0_3, %c0_4] : memref<1x256xf32, #tpu.memory_space<vmem>>, vector<1x256xf32>
    %4 = vector.broadcast %3 : vector<1x256xf32> to vector<16x256xf32>
    %5 = arith.addf %2, %4 : vector<16x256xf32>
    %cst_5 = arith.constant 0.000000e+00 : f32
    %6 = vector.broadcast %cst_5 : f32 to vector<16x256xf32>
    %7 = arith.maximumf %5, %6 : vector<16x256xf32>
    %8 = vector.extract_strided_slice %7 {offsets = [0, 0], sizes = [16, 128], strides = [1, 1]} : vector<16x256xf32> to vector<16x128xf32>
    %9 = arith.truncf %8 : vector<16x128xf32> to vector<16x128xbf16>
    %10 = vector.extract_strided_slice %7 {offsets = [0, 128], sizes = [16, 128], strides = [1, 1]} : vector<16x256xf32> to vector<16x128xf32>
    %11 = arith.truncf %10 : vector<16x128xf32> to vector<16x128xbf16>
    %c0_6 = arith.constant 0 : index
    %c0_7 = arith.constant 0 : index
    %12 = vector.load %arg4[%c0_6, %c0_7] : memref<128x128xbf16, #tpu.memory_space<vmem>>, vector<128x128xbf16>
    %c0_8 = arith.constant 0 : index
    %c0_9 = arith.constant 0 : index
    %13 = vector.load %arg5[%c0_8, %c0_9] : memref<128x128xbf16, #tpu.memory_space<vmem>>, vector<128x128xbf16>
    %c0_10 = arith.constant 0 : index
    %c0_11 = arith.constant 0 : index
    %14 = vector.load %arg6[%c0_10, %c0_11] : memref<1x128xf32, #tpu.memory_space<vmem>>, vector<1x128xf32>
    %c0_12 = arith.constant 0 : index
    %c0_13 = arith.constant 0 : index
    %15 = vector.load %arg7[%c0_12, %c0_13] : memref<1x128xf32, #tpu.memory_space<vmem>>, vector<1x128xf32>
    %cst_14 = arith.constant dense<0.000000e+00> : vector<16x128xf32>
    %16 = tpu.matmul %9, %12, %cst_14 {dimension_numbers = #tpu.dot_dimension_numbers<[1], [0], [0], [1], [0, 0, 1, 1], [], []>} : vector<16x128xbf16>, vector<128x128xbf16>, vector<16x128xf32> -> vector<16x128xf32>
    %17 = vector.broadcast %14 : vector<1x128xf32> to vector<16x128xf32>
    %18 = arith.addf %16, %17 : vector<16x128xf32>
    %cst_15 = arith.constant 0.000000e+00 : f32
    %19 = vector.broadcast %cst_15 : f32 to vector<16x128xf32>
    %20 = arith.maximumf %18, %19 : vector<16x128xf32>
    %21 = arith.truncf %20 : vector<16x128xf32> to vector<16x128xbf16>
    %cst_16 = arith.constant dense<0.000000e+00> : vector<16x128xf32>
    %22 = tpu.matmul %11, %13, %cst_16 {dimension_numbers = #tpu.dot_dimension_numbers<[1], [0], [0], [1], [0, 0, 1, 1], [], []>} : vector<16x128xbf16>, vector<128x128xbf16>, vector<16x128xf32> -> vector<16x128xf32>
    %23 = vector.broadcast %15 : vector<1x128xf32> to vector<16x128xf32>
    %24 = arith.addf %22, %23 : vector<16x128xf32>
    %cst_17 = arith.constant 0.000000e+00 : f32
    %25 = vector.broadcast %cst_17 : f32 to vector<16x128xf32>
    %26 = arith.maximumf %24, %25 : vector<16x128xf32>
    %27 = arith.truncf %26 : vector<16x128xf32> to vector<16x128xbf16>
    %c0_18 = arith.constant 0 : index
    %c0_19 = arith.constant 0 : index
    %28 = vector.load %arg8[%c0_18, %c0_19] : memref<128x128xbf16, #tpu.memory_space<vmem>>, vector<128x128xbf16>
    %c0_20 = arith.constant 0 : index
    %c0_21 = arith.constant 0 : index
    %29 = vector.load %arg9[%c0_20, %c0_21] : memref<128x128xbf16, #tpu.memory_space<vmem>>, vector<128x128xbf16>
    %c0_22 = arith.constant 0 : index
    %c0_23 = arith.constant 0 : index
    %30 = vector.load %arg10[%c0_22, %c0_23] : memref<1x128xf32, #tpu.memory_space<vmem>>, vector<1x128xf32>
    %cst_24 = arith.constant dense<0.000000e+00> : vector<16x128xf32>
    %31 = tpu.matmul %21, %28, %cst_24 {dimension_numbers = #tpu.dot_dimension_numbers<[1], [0], [0], [1], [0, 0, 1, 1], [], []>} : vector<16x128xbf16>, vector<128x128xbf16>, vector<16x128xf32> -> vector<16x128xf32>
    %cst_25 = arith.constant dense<0.000000e+00> : vector<16x128xf32>
    %32 = tpu.matmul %27, %29, %cst_25 {dimension_numbers = #tpu.dot_dimension_numbers<[1], [0], [0], [1], [0, 0, 1, 1], [], []>} : vector<16x128xbf16>, vector<128x128xbf16>, vector<16x128xf32> -> vector<16x128xf32>
    %33 = arith.addf %31, %32 : vector<16x128xf32>
    %34 = vector.broadcast %30 : vector<1x128xf32> to vector<16x128xf32>
    %35 = arith.addf %33, %34 : vector<16x128xf32>
    %c0_26 = arith.constant 0 : index
    %c0_27 = arith.constant 0 : index
    %36 = vector.load %arg11[%c0_26, %c0_27] : memref<16x128xf32, #tpu.memory_space<vmem>>, vector<16x128xf32>
    tpu.vector_store %arg11[%c0_26, %c0_27], %35 {strides = array<i32>} : memref<16x128xf32, #tpu.memory_space<vmem>>, vector<16x128xf32>,
    return
  }
  func.func @transform_0(%arg0: i32) -> (i32, i32) {
    %c0_i32 = arith.constant 0 : i32
    %c0_i32_0 = arith.constant 0 : i32
    return %arg0, %c0_i32 : i32, i32
  }
  func.func @transform_1(%arg0: i32) -> (i32, i32) {
    %c0_i32 = arith.constant 0 : i32
    %c0_i32_0 = arith.constant 0 : i32
    %c0_i32_1 = arith.constant 0 : i32
    return %c0_i32, %c0_i32_0 : i32, i32
  }
  func.func @transform_2(%arg0: i32) -> (i32, i32) {
    %c0_i32 = arith.constant 0 : i32
    %c0_i32_0 = arith.constant 0 : i32
    %c0_i32_1 = arith.constant 0 : i32
    return %c0_i32, %c0_i32_0 : i32, i32
  }
  func.func @transform_3(%arg0: i32) -> (i32, i32) {
    %c0_i32 = arith.constant 0 : i32
    %c0_i32_0 = arith.constant 0 : i32
    %c0_i32_1 = arith.constant 0 : i32
    return %c0_i32, %c0_i32_0 : i32, i32
  }
  func.func @transform_4(%arg0: i32) -> (i32, i32) {
    %c0_i32 = arith.constant 0 : i32
    %c0_i32_0 = arith.constant 0 : i32
    %c0_i32_1 = arith.constant 0 : i32
    return %c0_i32, %c0_i32_0 : i32, i32
  }
  func.func @transform_5(%arg0: i32) -> (i32, i32) {
    %c0_i32 = arith.constant 0 : i32
    %c0_i32_0 = arith.constant 0 : i32
    %c0_i32_1 = arith.constant 0 : i32
    return %c0_i32, %c0_i32_0 : i32, i32
  }
  func.func @transform_6(%arg0: i32) -> (i32, i32) {
    %c0_i32 = arith.constant 0 : i32
    %c0_i32_0 = arith.constant 0 : i32
    %c0_i32_1 = arith.constant 0 : i32
    return %c0_i32, %c0_i32_0 : i32, i32
  }
  func.func @transform_7(%arg0: i32) -> (i32, i32) {
    %c0_i32 = arith.constant 0 : i32
    %c0_i32_0 = arith.constant 0 : i32
    %c0_i32_1 = arith.constant 0 : i32
    return %c0_i32, %c0_i32_0 : i32, i32
  }
  func.func @transform_8(%arg0: i32) -> (i32, i32) {
    %c0_i32 = arith.constant 0 : i32
    %c0_i32_0 = arith.constant 0 : i32
    %c0_i32_1 = arith.constant 0 : i32
    return %c0_i32, %c0_i32_0 : i32, i32
  }
  func.func @transform_9(%arg0: i32) -> (i32, i32) {
    %c0_i32 = arith.constant 0 : i32
    %c0_i32_0 = arith.constant 0 : i32
    %c0_i32_1 = arith.constant 0 : i32
    return %c0_i32, %c0_i32_0 : i32, i32
  }
  func.func @transform_10(%arg0: i32) -> (i32, i32) {
    %c0_i32 = arith.constant 0 : i32
    %c0_i32_0 = arith.constant 0 : i32
    return %arg0, %c0_i32 : i32, i32
  }
}

</mosaic_0001>

<bundles_post_ra>
// kernel: tpu_custom_call.1
= control target key start
LH: loop header
LB: loop body
LE: loop exit
PB: predicated region body
PF: predicated region fallthrough
CT: control target
= control target key end

     0   :  { %15 = vsyncpa [#allocation3], 0  ;;  %s1307_s0 = inlined_call_operand.hbm [shape: bf16[16,128], index: 0, kind: input, shape index: {}]   ;;  %s1308_s1 = inlined_call_operand.hbm [shape: bf16[128,256], index: 1, kind: input, shape index: {}]   ;;  %s1309_s2 = inlined_call_operand.vmem [shape: f32[1,256], index: 2, kind: input, shape index: {}]   ;;  %s1310_s3 = inlined_call_operand.hbm [shape: bf16[128,128], index: 3, kind: input, shape index: {}]   ;;  %s1311_s4 = inlined_call_operand.hbm [shape: bf16[128,128], index: 4, kind: input, shape index: {}]   ;;  %s1312_s5 = inlined_call_operand.vmem [shape: f32[1,128], index: 5, kind: input, shape index: {}]   ;;  %s1313_s6 = inlined_call_operand.vmem [shape: f32[1,128], index: 6, kind: input, shape index: {}]   ;;  %s1314_s7 = inlined_call_operand.hbm [shape: bf16[128,128], index: 7, kind: input, shape index: {}]   ;;  %s1315_s8 = inlined_call_operand.hbm [shape: bf16[128,128], index: 8, kind: input, shape index: {}]   ;;  %s1316_s9 = inlined_call_operand.vmem [shape: f32[1,128], index: 9, kind: input, shape index: {}]   ;;  %s1317_s10 = inlined_call_operand.hbm [shape: f32[16,128], index: 10, kind: output, shape index: {}]  }
   0x1   :  { %16 = vsyncpa [#allocation6], 0 }
   0x2   :  { %17 = vsyncpa [#allocation9], 0 }
   0x3   :  { %18 = vsyncpa [#allocation12], 0 }
   0x4   :  { %19 = vsyncpa [#allocation4], 0  ;;  %s1144_s13 = smov [#allocation5]  }
   0x5   :  { %s37_s14 = sshll.u32 %s1144_s13, 4  ;;  %s38_s14 = int_to_ptr.vmem [resolvable:$true] %s37_s14 }
   0x6   :  { %s1002_s15 = scalar_lea.vmem %s38_s14, 2048  ;;  %p1007_p1 = scmp.lt.s32.totalorder %s38_s14, %s38_s14 }
   0x7   :  { %p1003_p0 = scmp.ne.s32.totalorder %s38_s14, %s1002_s15  ;;  %p1008_p2 = scmp.lt.s32.totalorder %s1002_s15, %s1002_s15 }
   0x9   :  { %p1009_p3 = por %p1008_p2, %p1007_p1 }
   0xb   :  { %p1010_p4 = pnand %p1009_p3, %p1003_p0 }
   0xd   :  { %1013 = shalt.err (!%p1010_p4)
}
   0xe   :  { %s1145_s16 = smov 128   ;;  %s1146_s17 = smov 8  }
   0xf   :  { %43 = dma.hbm_to_vmem [thread:$0]  %s1308_s1, 2048, %s38_s14, [#allocation6], %s1145_s16, %s1145_s16, %s1146_s17  }
  0x10   :  { %s1147_s20 = smov [#allocation8]   ;;  %s1148_s22 = smov [#allocation2]  }
  0x11   :  { %s63_s21 = sshll.u32 %s1147_s20, 4  ;;  %s25_s23 = sshll.u32 %s1148_s22, 4  ;;  %s64_s21 = int_to_ptr.vmem [resolvable:$true] %s63_s21  ;;  %s26_s23 = int_to_ptr.vmem [resolvable:$true] %s25_s23 }
  0x12   :  { %s1022_s24 = scalar_lea.vmem %s64_s21, 1024  ;;  %p1027_p6 = scmp.lt.s32.totalorder %s64_s21, %s64_s21 }
  0x13   :  { %p1023_p5 = scmp.ne.s32.totalorder %s64_s21, %s1022_s24  ;;  %p1028_p7 = scmp.lt.s32.totalorder %s1022_s24, %s1022_s24 }
  0x15   :  { %p1029_p8 = por %p1028_p7, %p1027_p6 }
  0x17   :  { %p1030_p9 = pnand %p1029_p8, %p1023_p5 }
  0x19   :  { %1033 = shalt.err (!%p1030_p9)
}
  0x1a   :  { %s1149_s25 = smov 64   ;;  %s1150_s26 = smov 4  }
  0x1b   :  { %69 = dma.hbm_to_vmem [thread:$0]  %s1311_s4, 1024, %s64_s21, [#allocation9], %s1149_s25, %s1149_s25, %s1150_s26  }
  0x1c   :  { %s1042_s1 = scalar_lea.vmem %s26_s23, 128  ;;  %p1047_p11 = scmp.lt.s32.totalorder %s26_s23, %s26_s23 }
  0x1d   :  { %p1043_p10 = scmp.ne.s32.totalorder %s26_s23, %s1042_s1  ;;  %p1048_p12 = scmp.lt.s32.totalorder %s1042_s1, %s1042_s1 }
  0x1f   :  { %p1049_p13 = por %p1048_p12, %p1047_p11 }
  0x21   :  { %p1050_p0 = pnand %p1049_p13, %p1043_p10 }
  0x23   :  { %1053 = shalt.err (!%p1050_p0)
}
  0x24   :  { %31 = dma.hbm_to_vmem [thread:$0]  %s1307_s0, 128, %s26_s23, [#allocation3], %s1149_s25, %s1149_s25, %s1150_s26  }
  0x25   :  { %s1151_s11 = smov [#allocation7]   ;;  %s1152_s13 = smov [#allocation10]  }
  0x26   :  { %s51_s12 = sshll.u32 %s1151_s11, 4  ;;  %s79_s4 = sshll.u32 %s1152_s13, 4  ;;  %s52_s12 = int_to_ptr.vmem [resolvable:$true] %s51_s12  ;;  %s80_s4 = int_to_ptr.vmem [resolvable:$true] %s79_s4 }
  0x27   :  { %s1062_s14 = scalar_lea.vmem %s52_s12, 1024  ;;  %p1067_p2 = scmp.lt.s32.totalorder %s52_s12, %s52_s12 }
  0x28   :  { %p1063_p1 = scmp.ne.s32.totalorder %s52_s12, %s1062_s14  ;;  %p1068_p3 = scmp.lt.s32.totalorder %s1062_s14, %s1062_s14 }
  0x2a   :  { %p1069_p4 = por %p1068_p3, %p1067_p2 }
  0x2c   :  { %p1070_p5 = pnand %p1069_p4, %p1063_p1 }
  0x2e   :  { %1073 = shalt.err (!%p1070_p5)
}
  0x2f   :  { %57 = dma.hbm_to_vmem [thread:$0]  %s1310_s3, 1024, %s52_s12, [#allocation6], %s1149_s25, %s1149_s25, %s1150_s26  }
  0x30   :  { %s1082_s0 = scalar_lea.vmem %s80_s4, 1024  ;;  %p1087_p7 = scmp.lt.s32.totalorder %s80_s4, %s80_s4 }
  0x31   :  { %p1083_p6 = scmp.ne.s32.totalorder %s80_s4, %s1082_s0  ;;  %p1088_p8 = scmp.lt.s32.totalorder %s1082_s0, %s1082_s0 }
  0x33   :  { %p1089_p9 = por %p1088_p8, %p1087_p7 }
  0x35   :  { %p1090_p10 = pnand %p1089_p9, %p1083_p6 }
  0x37   :  { %1093 = shalt.err (!%p1090_p10)
}
  0x38   :  { %85 = dma.hbm_to_vmem [thread:$0]  %s1314_s7, 1024, %s80_s4, [#allocation9], %s1149_s25, %s1149_s25, %s1150_s26  }
  0x39   :  { %s1153_s21 = smov [#allocation11]  }
  0x3a   :  { %s91_s22 = sshll.u32 %s1153_s21, 4  ;;  %s92_s22 = int_to_ptr.vmem [resolvable:$true] %s91_s22 }
  0x3b   :  { %s1102_s23 = scalar_lea.vmem %s92_s22, 1024  ;;  %p1107_p12 = scmp.lt.s32.totalorder %s92_s22, %s92_s22 }
  0x3c   :  { %p1103_p11 = scmp.ne.s32.totalorder %s92_s22, %s1102_s23  ;;  %p1108_p13 = scmp.lt.s32.totalorder %s1102_s23, %s1102_s23 }
  0x3e   :  { %p1109_p0 = por %p1108_p13, %p1107_p12 }
  0x40   :  { %p1110_p1 = pnand %p1109_p0, %p1103_p11 }
  0x42   :  { %1113 = shalt.err (!%p1110_p1)
}
  0x43   :  { %97 = dma.hbm_to_vmem [thread:$0]  %s1315_s8, 1024, %s92_s22, [#allocation12], %s1149_s25, %s1149_s25, %s1150_s26  }
  0x44   :  { %1134 = dma.done.wait [#allocation3], 128  }
  0x45   :  { %1135 = vsyncadd [#allocation3], 4294967168 }
  0x46   :  { %1136 = dma.done.wait [#allocation6], 3072  }
  0x47   :  { %1137 = vsyncadd [#allocation6], 4294964224 }
  0x48   :  { %1138 = dma.done.wait [#allocation9], 2048  }
  0x49   :  { %1139 = vsyncadd [#allocation9], 4294965248 }
  0x4a   :  { %1140 = dma.done.wait [#allocation12], 1024  }
  0x4b   :  { %1141 = vsyncadd [#allocation12], 4294966272  ;;  %v1154_v0 = vmov 0   ;;  %v1155_v1 = vmov 0.0   ;;  %v937_v2 = vld [vmem:[#allocation5 + $0x74] ss:$8 sps:$4 sm:$0xff]   ;;  %v139_v35 = vlaneseq }
  0x4c   :  { %267 = vmatprep.mubr.bf16.mxu0 %v1154_v0  ;;  %843 = vmatprep.subr.bf16.mxu1 %v1155_v1  ;;  %v939_v3 = vld [vmem:[#allocation5 + $0x70] ss:$8 sps:$4 sm:$0xff]   ;;  %v940_v4 = vld [vmem:[#allocation5 + $0x64] ss:$8 sps:$4 sm:$0xff]   ;;  %v942_v5 = vld [vmem:[#allocation5 + $0x60] ss:$8 sps:$4 sm:$0xff]  }
  0x4d   :  { %235 = vmatprep.subr.bf16.mxu0 %v937_v2  ;;  %v943_v6 = vld [vmem:[#allocation5 + $0x54] ss:$8 sps:$4 sm:$0xff]   ;;  %v945_v7 = vld [vmem:[#allocation5 + $0x50] ss:$8 sps:$4 sm:$0xff]   ;;  %v946_v8 = vld [vmem:[#allocation5 + $0x44] ss:$8 sps:$4 sm:$0xff]  }
  0x4e   :  { %236 = vmatpush1.bf16.msra.mxu0 %v939_v3  ;;  %v948_v9 = vld [vmem:[#allocation5 + $0x40] ss:$8 sps:$4 sm:$0xff]   ;;  %v949_v10 = vld [vmem:[#allocation5 + $0x34] ss:$8 sps:$4 sm:$0xff]   ;;  %v951_v13 = vld [vmem:[#allocation5 + $0x30] ss:$8 sps:$4 sm:$0xff]  }
  0x4f   :  { %237 = vmatprep.subr.bf16.mxu0 %v940_v4  ;;  %v962_v11 = vld [vmem:[#allocation7 + $0x38] sm:$0xff]   ;;  %v964_v12 = vld [vmem:[#allocation7 + $0x30] sm:$0xff]   ;;  %v952_v14 = vld [vmem:[#allocation5 + $0x24] ss:$8 sps:$4 sm:$0xff]   ;;  %vm1156_vm0 = vmmov 0   ;;  %v140_v36 = vshrl.u32 %v139_v35, 7 }
  0x50   :  { %844 = vmatpush3.bf16.msra.mxu1 %v962_v11  ;;  %v966_v15 = vld [vmem:[#allocation7 + $0x28] sm:$0xff]   ;;  %v955_v17 = vld [vmem:[#allocation5 + $0x14] ss:$8 sps:$4 sm:$0xff]   ;;  %v957_v18 = vld [vmem:[#allocation5 + $0x10] ss:$8 sps:$4 sm:$0xff]   ;;  %859 = vmatprep.mubr.msk.bf16.mxu1 %vm1156_vm0, %v1155_v1  ;;  %s1157_s28 = smov [#allocation13]  }
  0x51   :  { %845 = vmatprep.subr.bf16.mxu1 %v1155_v1  ;;  %v954_v16 = vld [vmem:[#allocation5 + $0x20] ss:$8 sps:$4 sm:$0xff]   ;;  %v958_v20 = vld [vmem:[#allocation5 + $0x4] ss:$8 sps:$4 sm:$0xff]   ;;  %v970_v21 = vld [vmem:[#allocation7 + $0x18] sm:$0xff]   ;;  %v141_v37 = vsub.s32 0, %v140_v36 }
  0x52   :  { %238 = vmatpush1.bf16.msra.mxu0 %v942_v5  ;;  %v968_v19 = vld [vmem:[#allocation7 + $0x20] sm:$0xff]   ;;  %v961_v23 = vld [vmem:[#allocation2] sm:$0xff]   ;;  %v965_v25 = vld [vmem:[#allocation8 + $0x30] sm:$0xff]   ;;  %v145_v39 = vsub.s32 1, %v140_v36  ;;  %s740_s1 = sshll.u32 %s1157_s28, 4  ;;  %s741_s1 = int_to_ptr.vmem [resolvable:$true] %s740_s1 }
  0x53   :  { %239 = vmatprep.subr.bf16.mxu0 %v943_v6  ;;  %v960_v22 = vld [vmem:[#allocation5] ss:$8 sps:$4 sm:$0xff]   ;;  %v963_v24 = vld [vmem:[#allocation8 + $0x38] sm:$0xff]   ;;  %v972_v29 = vld [vmem:[#allocation7 + $0x10] sm:$0xff]   ;;  %s1114_s29 = scalar_lea.vmem %s741_s1, 256  ;;  %p1119_p3 = scmp.lt.s32.totalorder %s741_s1, %s741_s1 }
  0x54   :  { %846 = vmatpush3.bf16.msra.mxu1 %v964_v12  ;;  %v967_v26 = vld [vmem:[#allocation8 + $0x28] sm:$0xff]   ;;  %v969_v27 = vld [vmem:[#allocation8 + $0x20] sm:$0xff]   ;;  %v971_v28 = vld [vmem:[#allocation8 + $0x18] sm:$0xff]   ;;  %p1115_p2 = scmp.ne.s32.totalorder %s741_s1, %s1114_s29  ;;  %p1120_p4 = scmp.lt.s32.totalorder %s1114_s29, %s1114_s29 }
  0x55   :  { %847 = vmatprep.subr.bf16.mxu1 %v1155_v1  ;;  %v973_v30 = vld [vmem:[#allocation8 + $0x10] sm:$0xff]   ;;  %v974_v31 = vld [vmem:[#allocation7 + $0x8] sm:$0xff]   ;;  %v976_v33 = vld [vmem:[#allocation7] sm:$0xff]  }
  0x56   :  { %240 = vmatpush1.bf16.msra.mxu0 %v945_v7  ;;  %v975_v32 = vld [vmem:[#allocation8 + $0x8] sm:$0xff]   ;;  %v977_v34 = vld [vmem:[#allocation8] sm:$0xff]   ;;  %v137_v38 = vld [vmem:[%s1309_s2] sm:$0x3]  ;;  %p1121_p5 = por %p1120_p4, %p1119_p3 }
  0x57   :  { %241 = vmatprep.subr.bf16.mxu0 %v946_v8  ;;  %v142_v40 = vrot.slane %v137_v38, %v141_v37  ;;  %v146_v42 = vrot.slane %v137_v38, %v145_v39  ;;  %v979_v52 = vld [vmem:[#allocation11 + $0x38] sm:$0xff]   ;;  %v981_v58 = vld [vmem:[#allocation11 + $0x30] sm:$0xff]   ;;  %v983_v60 = vld [vmem:[#allocation11 + $0x28] sm:$0xff]  }
  0x58   :  { %848 = vmatpush3.bf16.msra.mxu1 %v966_v15  ;;  %v978_v56 = vld [vmem:[#allocation10 + $0x38] sm:$0xff]   ;;  %v980_v59 = vld [vmem:[#allocation10 + $0x30] sm:$0xff]   ;;  %v982_v61 = vld [vmem:[#allocation10 + $0x28] sm:$0xff]   ;;  %p1122_p6 = pnand %p1121_p5, %p1115_p2 }
  0x59   :  { %849 = vmatprep.subr.bf16.mxu1 %v1155_v1  ;;  %v985_v62 = vld [vmem:[#allocation11 + $0x20] sm:$0xff]   ;;  %v987_v0 = vld [vmem:[#allocation11 + $0x18] sm:$0xff]   ;;  %v988_v3 = vld [vmem:[#allocation10 + $0x10] sm:$0xff]  }
  0x5a   :  { %242 = vmatpush1.bf16.msra.mxu0 %v948_v9  ;;  %v984_v63 = vld [vmem:[#allocation10 + $0x20] sm:$0xff]   ;;  %v986_v2 = vld [vmem:[#allocation10 + $0x18] sm:$0xff]   ;;  %v989_v4 = vld [vmem:[#allocation11 + $0x10] sm:$0xff]  }
  0x5b   :  { %243 = vmatprep.subr.bf16.mxu0 %v949_v10  ;;  %v990_v5 = vld [vmem:[#allocation10 + $0x8] sm:$0xff]   ;;  %v992_v7 = vld [vmem:[#allocation10] sm:$0xff]   ;;  %v772_v9 = vld [vmem:[%s1312_s5] ss:$0 sm:$0xff] }
  0x5c   :  { %850 = vmatpush3.bf16.msra.mxu1 %v968_v19  ;;  %v991_v6 = vld [vmem:[#allocation11 + $0x8] sm:$0xff]   ;;  %v993_v8 = vld [vmem:[#allocation11] sm:$0xff]   ;;  %v781_v12 = vld [vmem:[%s1313_s6] ss:$0 sm:$0xff] }
  0x5d   :  { %851 = vmatprep.subr.bf16.mxu1 %v1155_v1 }
  0x5e   :  { %244 = vmatpush1.bf16.msra.mxu0 %v951_v13 }
  0x5f   :  { %245 = vmatprep.subr.bf16.mxu0 %v952_v14 }
  0x60   :  { %852 = vmatpush3.bf16.msra.mxu1 %v970_v21 }
  0x61   :  { %853 = vmatprep.subr.bf16.mxu1 %v1155_v1 }
  0x62   :  { %246 = vmatpush1.bf16.msra.mxu0 %v954_v16 }
  0x63   :  { %247 = vmatprep.subr.bf16.mxu0 %v955_v17 }
  0x64   :  { %854 = vmatpush3.bf16.msra.mxu1 %v972_v29  ;;  %v806_v29 = vld [vmem:[%s1316_s9] ss:$0 sm:$0xff] }
  0x65   :  { %855 = vmatprep.subr.bf16.mxu1 %v1155_v1 }
  0x66   :  { %248 = vmatpush1.bf16.msra.mxu0 %v957_v18 }
  0x67   :  { %249 = vmatprep.subr.bf16.mxu0 %v958_v20 }
  0x68   :  { %856 = vmatpush3.bf16.msra.mxu1 %v974_v31 }
  0x69   :  { %857 = vmatprep.subr.bf16.mxu1 %v1155_v1 }
  0x6a   :  { %250 = vmatpush1.bf16.msra.mxu0 %v960_v22 }
  0x6b   :  { %863 = vmatprep.subr.bf16.mxu0 %v1155_v1 }
  0x6c   :  { %858 = vmatpush3.bf16.msra.mxu1 %v976_v33 }
  0x6d   :  { %268 = vmatmul.mubr.bf16.vlgmr.msra.gmra.mxu0 %v961_v23  ;;  %883 = vmatprep.subr.bf16.mxu1 %v1155_v1 }
  0x6e   :  { %864 = vmatpush3.bf16.msra.mxu0 %v963_v24  ;;  %879 = vmatprep.mubr.msk.bf16.mxu0 %vm1156_vm0, %v1155_v1 }
  0x6f   :  { %865 = vmatprep.subr.bf16.mxu0 %v1155_v1 }
  0x72   :  { %866 = vmatpush3.bf16.msra.mxu0 %v965_v25 }
  0x73   :  { %867 = vmatprep.subr.bf16.mxu0 %v1155_v1 }
  0x76   :  { %868 = vmatpush3.bf16.msra.mxu0 %v967_v26 }
  0x77   :  { %869 = vmatprep.subr.bf16.mxu0 %v1155_v1 }
  0x7a   :  { %870 = vmatpush3.bf16.msra.mxu0 %v969_v27 }
  0x7b   :  { %871 = vmatprep.subr.bf16.mxu0 %v1155_v1 }
  0x7e   :  { %872 = vmatpush3.bf16.msra.mxu0 %v971_v28 }
  0x7f   :  { %873 = vmatprep.subr.bf16.mxu0 %v1155_v1 }
  0x82   :  { %874 = vmatpush3.bf16.msra.mxu0 %v973_v30 }
  0x83   :  { %875 = vmatprep.subr.bf16.mxu0 %v1155_v1 }
  0x86   :  { %876 = vmatpush3.bf16.msra.mxu0 %v975_v32 }
  0x87   :  { %877 = vmatprep.subr.bf16.mxu0 %v1155_v1 }
  0x8a   :  { %878 = vmatpush3.bf16.msra.mxu0 %v977_v34 }
  0x8b   :  { %903 = vmatprep.subr.bf16.mxu0 %v1155_v1 }
 0x12d   :  { %v269_v41 = vpop.f32.mrf.mxu0 }
 0x12e   :  { %v270_v44 = vadd.f32 %v269_v41, %v142_v40 }
 0x12f   :  { %v271_v43 = vpop.f32.mrf.mxu0 }
 0x130   :  { %v272_v46 = vadd.f32 %v271_v43, %v146_v42  ;;  %v278_v49 = vmax.f32 %v270_v44, 0.0 }
 0x131   :  { %v273_v45 = vpop.f32.mrf.mxu0 }
 0x132   :  { %v274_v47 = vadd.f32 %v273_v45, %v142_v40  ;;  %v279_v53 = vmax.f32 %v272_v46, 0.0 }
 0x133   :  { %v275_v48 = vpop.f32.mrf.mxu0 }
 0x134   :  { %v280_v50 = vmax.f32 %v274_v47, 0.0  ;;  %v276_v51 = vadd.f32 %v275_v48, %v146_v42 }
 0x136   :  { %v282_v54 = vpack.c.bf16 %v280_v50, %v278_v49  ;;  %v281_v55 = vmax.f32 %v276_v51, 0.0 }
 0x138   :  { %v283_v57 = vpack.c.bf16 %v281_v55, %v279_v53  ;;  %860 = vmatmul.mubr.bf16.vlgmr.msra.gmra.mxu1 %v282_v54 }
 0x139   :  { %884 = vmatpush3.bf16.msra.mxu1 %v979_v52  ;;  %899 = vmatprep.mubr.msk.bf16.mxu1 %vm1156_vm0, %v1155_v1 }
 0x13a   :  { %880 = vmatmul.mubr.bf16.vlgmr.msra.gmra.mxu0 %v283_v57  ;;  %885 = vmatprep.subr.bf16.mxu1 %v1155_v1 }
 0x13b   :  { %904 = vmatpush3.bf16.msra.mxu0 %v978_v56  ;;  %919 = vmatprep.mubr.msk.bf16.mxu0 %vm1156_vm0, %v1155_v1 }
 0x13c   :  { %905 = vmatprep.subr.bf16.mxu0 %v1155_v1 }
 0x13d   :  { %886 = vmatpush3.bf16.msra.mxu1 %v981_v58 }
 0x13e   :  { %887 = vmatprep.subr.bf16.mxu1 %v1155_v1 }
 0x13f   :  { %906 = vmatpush3.bf16.msra.mxu0 %v980_v59 }
 0x140   :  { %907 = vmatprep.subr.bf16.mxu0 %v1155_v1 }
 0x141   :  { %888 = vmatpush3.bf16.msra.mxu1 %v983_v60 }
 0x142   :  { %889 = vmatprep.subr.bf16.mxu1 %v1155_v1 }
 0x143   :  { %908 = vmatpush3.bf16.msra.mxu0 %v982_v61 }
 0x144   :  { %909 = vmatprep.subr.bf16.mxu0 %v1155_v1 }
 0x145   :  { %890 = vmatpush3.bf16.msra.mxu1 %v985_v62 }
 0x146   :  { %891 = vmatprep.subr.bf16.mxu1 %v1155_v1 }
 0x147   :  { %910 = vmatpush3.bf16.msra.mxu0 %v984_v63 }
 0x148   :  { %911 = vmatprep.subr.bf16.mxu0 %v1155_v1 }
 0x149   :  { %892 = vmatpush3.bf16.msra.mxu1 %v987_v0 }
 0x14a   :  { %893 = vmatprep.subr.bf16.mxu1 %v1155_v1 }
 0x14b   :  { %912 = vmatpush3.bf16.msra.mxu0 %v986_v2 }
 0x14c   :  { %913 = vmatprep.subr.bf16.mxu0 %v1155_v1 }
 0x14d   :  { %894 = vmatpush3.bf16.msra.mxu1 %v989_v4 }
 0x14e   :  { %895 = vmatprep.subr.bf16.mxu1 %v1155_v1 }
 0x14f   :  { %914 = vmatpush3.bf16.msra.mxu0 %v988_v3 }
 0x150   :  { %915 = vmatprep.subr.bf16.mxu0 %v1155_v1 }
 0x151   :  { %896 = vmatpush3.bf16.msra.mxu1 %v991_v6 }
 0x152   :  { %897 = vmatprep.subr.bf16.mxu1 %v1155_v1 }
 0x153   :  { %916 = vmatpush3.bf16.msra.mxu0 %v990_v5 }
 0x154   :  { %917 = vmatprep.subr.bf16.mxu0 %v1155_v1 }
 0x155   :  { %898 = vmatpush3.bf16.msra.mxu1 %v993_v8 }
 0x157   :  { %918 = vmatpush3.bf16.msra.mxu0 %v992_v7 }
 0x1f8   :  { %v406_v10 = vpop.f32.mrf.mxu1 }
 0x1f9   :  { %v407_v14 = vadd.f32 %v772_v9, %v406_v10 }
 0x1fa   :  { %v861_v11 = vpop.f32.mrf.mxu1  ;;  %v504_v13 = vpop.f32.mrf.mxu0 }
 0x1fb   :  { %v505_v17 = vadd.f32 %v781_v12, %v504_v13  ;;  %v413_v20 = vmax.f32 %v407_v14, 0.0 }
 0x1fc   :  { %v409_v15 = vpop.f32.mrf.mxu1  ;;  %v881_v16 = vpop.f32.mrf.mxu0 }
 0x1fd   :  { %v410_v18 = vadd.f32 %v772_v9, %v409_v15  ;;  %v511_v24 = vmax.f32 %v505_v17, 0.0 }
 0x1fe   :  { %v862_v1 = vpop.f32.mrf.mxu1  ;;  %v507_v19 = vpop.f32.mrf.mxu0 }
 0x1ff   :  { %v414_v21 = vmax.f32 %v410_v18, 0.0  ;;  %v508_v22 = vadd.f32 %v781_v12, %v507_v19 }
 0x200   :  { %v882_v23 = vpop.f32.mrf.mxu0 }
 0x201   :  { %v415_v25 = vpack.c.bf16 %v414_v21, %v413_v20  ;;  %v512_v26 = vmax.f32 %v508_v22, 0.0 }
 0x203   :  { %v513_v27 = vpack.c.bf16 %v512_v26, %v511_v24  ;;  %920 = vmatmul.mubr.bf16.vlgmr.msra.gmra.mxu0 %v415_v25 }
 0x205   :  { %900 = vmatmul.mubr.bf16.vlgmr.msra.gmra.mxu1 %v513_v27 }
 0x2c3   :  { %v718_v28 = vpop.f32.mrf.mxu0 }
 0x2c5   :  { %v629_v30 = vpop.f32.mrf.mxu1  ;;  %v921_v31 = vpop.f32.mrf.mxu0 }
 0x2c6   :  { %v719_v32 = vadd.f32 %v718_v28, %v629_v30 }
 0x2c7   :  { %v901_v33 = vpop.f32.mrf.mxu1  ;;  %v721_v34 = vpop.f32.mrf.mxu0 }
 0x2c8   :  { %v731_v35 = vadd.f32 %v806_v29, %v719_v32 }
 0x2c9   :  { %v632_v36 = vpop.f32.mrf.mxu1  ;;  %v922_v37 = vpop.f32.mrf.mxu0 }
 0x2ca   :  { %733 = vst [vmem:[#allocation13] sm:$0xff] %v731_v35  ;;  %v722_v38 = vadd.f32 %v721_v34, %v632_v36 }
 0x2cb   :  { %v902_v39 = vpop.f32.mrf.mxu1 }
 0x2cc   :  { %v732_v40 = vadd.f32 %v806_v29, %v722_v38 }
 0x2ce   :  { %734 = vst [vmem:[#allocation13 + $0x8] sm:$0xff] %v732_v40 }
 0x2cf   :  { %1125 = shalt.err (!%p1122_p6)
}
 0x2d0   :  { %746 = dma.vmem_to_hbm [thread:$0]  %s741_s1, 256, %s1317_s10, [#allocation4], %s1145_s16, %s1145_s16, %s1146_s17  }
 0x2d1   :  { %1142 = dma.done.wait [#allocation4], 256  }
 0x2d2   :  { %1143 = vsyncadd [#allocation4], 4294967040 }
 0x2d3   :  { %750 = vsyncpa [#allocation3], 1 }
 0x2d4   :  { %751 = vsyncpa [#allocation6], 1 }
 0x2d5   :  { %752 = vsyncpa [#allocation9], 1 }
 0x2d6   :  { %753 = vsyncpa [#allocation12], 1 }
 0x2d7   :  { %754 = vsyncpa [#allocation4], 1 }

// kernel: tpu_custom_call.1
= control target key start
LH: loop header
LB: loop body
LE: loop exit
PB: predicated region body
PF: predicated region fallthrough
CT: control target
= control target key end

     0   :  { %15 = vsyncpa [#allocation3], 0  ;;  %s1307_s0 = inlined_call_operand.hbm [shape: bf16[16,128], index: 0, kind: input, shape index: {}]   ;;  %s1308_s1 = inlined_call_operand.hbm [shape: bf16[128,256], index: 1, kind: input, shape index: {}]   ;;  %s1309_s2 = inlined_call_operand.vmem [shape: f32[1,256], index: 2, kind: input, shape index: {}]   ;;  %s1310_s3 = inlined_call_operand.hbm [shape: bf16[128,128], index: 3, kind: input, shape index: {}]   ;;  %s1311_s4 = inlined_call_operand.hbm [shape: bf16[128,128], index: 4, kind: input, shape index: {}]   ;;  %s1312_s5 = inlined_call_operand.vmem [shape: f32[1,128], index: 5, kind: input, shape index: {}]   ;;  %s1313_s6 = inlined_call_operand.vmem [shape: f32[1,128], index: 6, kind: input, shape index: {}]   ;;  %s1314_s7 = inlined_call_operand.hbm [shape: bf16[128,128], index: 7, kind: input, shape index: {}]   ;;  %s1315_s8 = inlined_call_operand.hbm [shape: bf16[128,128], index: 8, kind: input, shape index: {}]   ;;  %s1316_s9 = inlined_call_operand.vmem [shape: f32[1,128], index: 9, kind: input, shape index: {}]   ;;  %s1317_s10 = inlined_call_operand.hbm [shape: f32[16,128], index: 10, kind: output, shape index: {}]  }
   0x1   :  { %16 = vsyncpa [#allocation6], 0 }
   0x2   :  { %17 = vsyncpa [#allocation9], 0 }
   0x3   :  { %18 = vsyncpa [#allocation12], 0 }
   0x4   :  { %19 = vsyncpa [#allocation4], 0  ;;  %s1144_s13 = smov [#allocation5]  }
   0x5   :  { %s37_s14 = sshll.u32 %s1144_s13, 4  ;;  %s38_s14 = int_to_ptr.vmem [resolvable:$true] %s37_s14 }
   0x6   :  { %s1002_s15 = scalar_lea.vmem %s38_s14, 2048  ;;  %p1007_p1 = scmp.lt.s32.totalorder %s38_s14, %s38_s14 }
   0x7   :  { %p1003_p0 = scmp.ne.s32.totalorder %s38_s14, %s1002_s15  ;;  %p1008_p2 = scmp.lt.s32.totalorder %s1002_s15, %s1002_s15 }
   0x9   :  { %p1009_p3 = por %p1008_p2, %p1007_p1 }
   0xb   :  { %p1010_p4 = pnand %p1009_p3, %p1003_p0 }
   0xd   :  { %1013 = shalt.err (!%p1010_p4)
}
   0xe   :  { %s1145_s16 = smov 128   ;;  %s1146_s17 = smov 8  }
   0xf   :  { %43 = dma.hbm_to_vmem [thread:$0]  %s1308_s1, 2048, %s38_s14, [#allocation6], %s1145_s16, %s1145_s16, %s1146_s17  }
  0x10   :  { %s1147_s20 = smov [#allocation8]   ;;  %s1148_s22 = smov [#allocation2]  }
  0x11   :  { %s63_s21 = sshll.u32 %s1147_s20, 4  ;;  %s25_s23 = sshll.u32 %s1148_s22, 4  ;;  %s64_s21 = int_to_ptr.vmem [resolvable:$true] %s63_s21  ;;  %s26_s23 = int_to_ptr.vmem [resolvable:$true] %s25_s23 }
  0x12   :  { %s1022_s24 = scalar_lea.vmem %s64_s21, 1024  ;;  %p1027_p6 = scmp.lt.s32.totalorder %s64_s21, %s64_s21 }
  0x13   :  { %p1023_p5 = scmp.ne.s32.totalorder %s64_s21, %s1022_s24  ;;  %p1028_p7 = scmp.lt.s32.totalorder %s1022_s24, %s1022_s24 }
  0x15   :  { %p1029_p8 = por %p1028_p7, %p1027_p6 }
  0x17   :  { %p1030_p9 = pnand %p1029_p8, %p1023_p5 }
  0x19   :  { %1033 = shalt.err (!%p1030_p9)
}
  0x1a   :  { %s1149_s25 = smov 64   ;;  %s1150_s26 = smov 4  }
  0x1b   :  { %69 = dma.hbm_to_vmem [thread:$0]  %s1311_s4, 1024, %s64_s21, [#allocation9], %s1149_s25, %s1149_s25, %s1150_s26  }
  0x1c   :  { %s1042_s1 = scalar_lea.vmem %s26_s23, 128  ;;  %p1047_p11 = scmp.lt.s32.totalorder %s26_s23, %s26_s23 }
  0x1d   :  { %p1043_p10 = scmp.ne.s32.totalorder %s26_s23, %s1042_s1  ;;  %p1048_p12 = scmp.lt.s32.totalorder %s1042_s1, %s1042_s1 }
  0x1f   :  { %p1049_p13 = por %p1048_p12, %p1047_p11 }
  0x21   :  { %p1050_p0 = pnand %p1049_p13, %p1043_p10 }
  0x23   :  { %1053 = shalt.err (!%p1050_p0)
}
  0x24   :  { %31 = dma.hbm_to_vmem [thread:$0]  %s1307_s0, 128, %s26_s23, [#allocation3], %s1149_s25, %s1149_s25, %s1150_s26  }
  0x25   :  { %s1151_s11 = smov [#allocation7]   ;;  %s1152_s13 = smov [#allocation10]  }
  0x26   :  { %s51_s12 = sshll.u32 %s1151_s11, 4  ;;  %s79_s4 = sshll.u32 %s1152_s13, 4  ;;  %s52_s12 = int_to_ptr.vmem [resolvable:$true] %s51_s12  ;;  %s80_s4 = int_to_ptr.vmem [resolvable:$true] %s79_s4 }
  0x27   :  { %s1062_s14 = scalar_lea.vmem %s52_s12, 1024  ;;  %p1067_p2 = scmp.lt.s32.totalorder %s52_s12, %s52_s12 }
  0x28   :  { %p1063_p1 = scmp.ne.s32.totalorder %s52_s12, %s1062_s14  ;;  %p1068_p3 = scmp.lt.s32.totalorder %s1062_s14, %s1062_s14 }
  0x2a   :  { %p1069_p4 = por %p1068_p3, %p1067_p2 }
  0x2c   :  { %p1070_p5 = pnand %p1069_p4, %p1063_p1 }
  0x2e   :  { %1073 = shalt.err (!%p1070_p5)
}
  0x2f   :  { %57 = dma.hbm_to_vmem [thread:$0]  %s1310_s3, 1024, %s52_s12, [#allocation6], %s1149_s25, %s1149_s25, %s1150_s26  }
  0x30   :  { %s1082_s0 = scalar_lea.vmem %s80_s4, 1024  ;;  %p1087_p7 = scmp.lt.s32.totalorder %s80_s4, %s80_s4 }
  0x31   :  { %p1083_p6 = scmp.ne.s32.totalorder %s80_s4, %s1082_s0  ;;  %p1088_p8 = scmp.lt.s32.totalorder %s1082_s0, %s1082_s0 }
  0x33   :  { %p1089_p9 = por %p1088_p8, %p1087_p7 }
  0x35   :  { %p1090_p10 = pnand %p1089_p9, %p1083_p6 }
  0x37   :  { %1093 = shalt.err (!%p1090_p10)
}
  0x38   :  { %85 = dma.hbm_to_vmem [thread:$0]  %s1314_s7, 1024, %s80_s4, [#allocation9], %s1149_s25, %s1149_s25, %s1150_s26  }
  0x39   :  { %s1153_s21 = smov [#allocation11]  }
  0x3a   :  { %s91_s22 = sshll.u32 %s1153_s21, 4  ;;  %s92_s22 = int_to_ptr.vmem [resolvable:$true] %s91_s22 }
  0x3b   :  { %s1102_s23 = scalar_lea.vmem %s92_s22, 1024  ;;  %p1107_p12 = scmp.lt.s32.totalorder %s92_s22, %s92_s22 }
  0x3c   :  { %p1103_p11 = scmp.ne.s32.totalorder %s92_s22, %s1102_s23  ;;  %p1108_p13 = scmp.lt.s32.totalorder %s1102_s23, %s1102_s23 }
  0x3e   :  { %p1109_p0 = por %p1108_p13, %p1107_p12 }
  0x40   :  { %p1110_p1 = pnand %p1109_p0, %p1103_p11 }
  0x42   :  { %1113 = shalt.err (!%p1110_p1)
}
  0x43   :  { %97 = dma.hbm_to_vmem [thread:$0]  %s1315_s8, 1024, %s92_s22, [#allocation12], %s1149_s25, %s1149_s25, %s1150_s26  }
  0x44   :  { %1134 = dma.done.wait [#allocation3], 128  }
  0x45   :  { %1135 = vsyncadd [#allocation3], 4294967168 }
  0x46   :  { %1136 = dma.done.wait [#allocation6], 3072  }
  0x47   :  { %1137 = vsyncadd [#allocation6], 4294964224 }
  0x48   :  { %1138 = dma.done.wait [#allocation9], 2048  }
  0x49   :  { %1139 = vsyncadd [#allocation9], 4294965248 }
  0x4a   :  { %1140 = dma.done.wait [#allocation12], 1024  }
  0x4b   :  { %1141 = vsyncadd [#allocation12], 4294966272  ;;  %v1154_v0 = vmov 0   ;;  %v1155_v1 = vmov 0.0   ;;  %v937_v2 = vld [vmem:[#allocation5 + $0x74] ss:$8 sps:$4 sm:$0xff]   ;;  %v139_v35 = vlaneseq }
  0x4c   :  { %267 = vmatprep.mubr.bf16.mxu0 %v1154_v0  ;;  %843 = vmatprep.subr.bf16.mxu1 %v1155_v1  ;;  %v939_v3 = vld [vmem:[#allocation5 + $0x70] ss:$8 sps:$4 sm:$0xff]   ;;  %v940_v4 = vld [vmem:[#allocation5 + $0x64] ss:$8 sps:$4 sm:$0xff]   ;;  %v942_v5 = vld [vmem:[#allocation5 + $0x60] ss:$8 sps:$4 sm:$0xff]  }
  0x4d   :  { %235 = vmatprep.subr.bf16.mxu0 %v937_v2  ;;  %v943_v6 = vld [vmem:[#allocation5 + $0x54] ss:$8 sps:$4 sm:$0xff]   ;;  %v945_v7 = vld [vmem:[#allocation5 + $0x50] ss:$8 sps:$4 sm:$0xff]   ;;  %v946_v8 = vld [vmem:[#allocation5 + $0x44] ss:$8 sps:$4 sm:$0xff]  }
  0x4e   :  { %236 = vmatpush1.bf16.msra.mxu0 %v939_v3  ;;  %v948_v9 = vld [vmem:[#allocation5 + $0x40] ss:$8 sps:$4 sm:$0xff]   ;;  %v949_v10 = vld [vmem:[#allocation5 + $0x34] ss:$8 sps:$4 sm:$0xff]   ;;  %v951_v13 = vld [vmem:[#allocation5 + $0x30] ss:$8 sps:$4 sm:$0xff]  }
  0x4f   :  { %237 = vmatprep.subr.bf16.mxu0 %v940_v4  ;;  %v962_v11 = vld [vmem:[#allocation7 + $0x38] sm:$0xff]   ;;  %v964_v12 = vld [vmem:[#allocation7 + $0x30] sm:$0xff]   ;;  %v952_v14 = vld [vmem:[#allocation5 + $0x24] ss:$8 sps:$4 sm:$0xff]   ;;  %vm1156_vm0 = vmmov 0   ;;  %v140_v36 = vshrl.u32 %v139_v35, 7 }
  0x50   :  { %844 = vmatpush3.bf16.msra.mxu1 %v962_v11  ;;  %v966_v15 = vld [vmem:[#allocation7 + $0x28] sm:$0xff]   ;;  %v955_v17 = vld [vmem:[#allocation5 + $0x14] ss:$8 sps:$4 sm:$0xff]   ;;  %v957_v18 = vld [vmem:[#allocation5 + $0x10] ss:$8 sps:$4 sm:$0xff]   ;;  %859 = vmatprep.mubr.msk.bf16.mxu1 %vm1156_vm0, %v1155_v1  ;;  %s1157_s28 = smov [#allocation13]  }
  0x51   :  { %845 = vmatprep.subr.bf16.mxu1 %v1155_v1  ;;  %v954_v16 = vld [vmem:[#allocation5 + $0x20] ss:$8 sps:$4 sm:$0xff]   ;;  %v958_v20 = vld [vmem:[#allocation5 + $0x4] ss:$8 sps:$4 sm:$0xff]   ;;  %v970_v21 = vld [vmem:[#allocation7 + $0x18] sm:$0xff]   ;;  %v141_v37 = vsub.s32 0, %v140_v36 }
  0x52   :  { %238 = vmatpush1.bf16.msra.mxu0 %v942_v5  ;;  %v968_v19 = vld [vmem:[#allocation7 + $0x20] sm:$0xff]   ;;  %v961_v23 = vld [vmem:[#allocation2] sm:$0xff]   ;;  %v965_v25 = vld [vmem:[#allocation8 + $0x30] sm:$0xff]   ;;  %v145_v39 = vsub.s32 1, %v140_v36  ;;  %s740_s1 = sshll.u32 %s1157_s28, 4  ;;  %s741_s1 = int_to_ptr.vmem [resolvable:$true] %s740_s1 }
  0x53   :  { %239 = vmatprep.subr.bf16.mxu0 %v943_v6  ;;  %v960_v22 = vld [vmem:[#allocation5] ss:$8 sps:$4 sm:$0xff]   ;;  %v963_v24 = vld [vmem:[#allocation8 + $0x38] sm:$0xff]   ;;  %v972_v29 = vld [vmem:[#allocation7 + $0x10] sm:$0xff]   ;;  %s1114_s29 = scalar_lea.vmem %s741_s1, 256  ;;  %p1119_p3 = scmp.lt.s32.totalorder %s741_s1, %s741_s1 }
  0x54   :  { %846 = vmatpush3.bf16.msra.mxu1 %v964_v12  ;;  %v967_v26 = vld [vmem:[#allocation8 + $0x28] sm:$0xff]   ;;  %v969_v27 = vld [vmem:[#allocation8 + $0x20] sm:$0xff]   ;;  %v971_v28 = vld [vmem:[#allocation8 + $0x18] sm:$0xff]   ;;  %p1115_p2 = scmp.ne.s32.totalorder %s741_s1, %s1114_s29  ;;  %p1120_p4 = scmp.lt.s32.totalorder %s1114_s29, %s1114_s29 }
  0x55   :  { %847 = vmatprep.subr.bf16.mxu1 %v1155_v1  ;;  %v973_v30 = vld [vmem:[#allocation8 + $0x10] sm:$0xff]   ;;  %v974_v31 = vld [vmem:[#allocation7 + $0x8] sm:$0xff]   ;;  %v976_v33 = vld [vmem:[#allocation7] sm:$0xff]  }
  0x56   :  { %240 = vmatpush1.bf16.msra.mxu0 %v945_v7  ;;  %v975_v32 = vld [vmem:[#allocation8 + $0x8] sm:$0xff]   ;;  %v977_v34 = vld [vmem:[#allocation8] sm:$0xff]   ;;  %v137_v38 = vld [vmem:[%s1309_s2] sm:$0x3]  ;;  %p1121_p5 = por %p1120_p4, %p1119_p3 }
  0x57   :  { %241 = vmatprep.subr.bf16.mxu0 %v946_v8  ;;  %v142_v40 = vrot.slane %v137_v38, %v141_v37  ;;  %v146_v42 = vrot.slane %v137_v38, %v145_v39  ;;  %v979_v52 = vld [vmem:[#allocation11 + $0x38] sm:$0xff]   ;;  %v981_v58 = vld [vmem:[#allocation11 + $0x30] sm:$0xff]   ;;  %v983_v60 = vld [vmem:[#allocation11 + $0x28] sm:$0xff]  }
  0x58   :  { %848 = vmatpush3.bf16.msra.mxu1 %v966_v15  ;;  %v978_v56 = vld [vmem:[#allocation10 + $0x38] sm:$0xff]   ;;  %v980_v59 = vld [vmem:[#allocation10 + $0x30] sm:$0xff]   ;;  %v982_v61 = vld [vmem:[#allocation10 + $0x28] sm:$0xff]   ;;  %p1122_p6 = pnand %p1121_p5, %p1115_p2 }
  0x59   :  { %849 = vmatprep.subr.bf16.mxu1 %v1155_v1  ;;  %v985_v62 = vld [vmem:[#allocation11 + $0x20] sm:$0xff]   ;;  %v987_v0 = vld [vmem:[#allocation11 + $0x18] sm:$0xff]   ;;  %v988_v3 = vld [vmem:[#allocation10 + $0x10] sm:$0xff]  }
  0x5a   :  { %242 = vmatpush1.bf16.msra.mxu0 %v948_v9  ;;  %v984_v63 = vld [vmem:[#allocation10 + $0x20] sm:$0xff]   ;;  %v986_v2 = vld [vmem:[#allocation10 + $0x18] sm:$0xff]   ;;  %v989_v4 = vld [vmem:[#allocation11 + $0x10] sm:$0xff]  }
  0x5b   :  { %243 = vmatprep.subr.bf16.mxu0 %v949_v10  ;;  %v990_v5 = vld [vmem:[#allocation10 + $0x8] sm:$0xff]   ;;  %v992_v7 = vld [vmem:[#allocation10] sm:$0xff]   ;;  %v772_v9 = vld [vmem:[%s1312_s5] ss:$0 sm:$0xff] }
  0x5c   :  { %850 = vmatpush3.bf16.msra.mxu1 %v968_v19  ;;  %v991_v6 = vld [vmem:[#allocation11 + $0x8] sm:$0xff]   ;;  %v993_v8 = vld [vmem:[#allocation11] sm:$0xff]   ;;  %v781_v12 = vld [vmem:[%s1313_s6] ss:$0 sm:$0xff] }
  0x5d   :  { %851 = vmatprep.subr.bf16.mxu1 %v1155_v1 }
  0x5e   :  { %244 = vmatpush1.bf16.msra.mxu0 %v951_v13 }
  0x5f   :  { %245 = vmatprep.subr.bf16.mxu0 %v952_v14 }
  0x60   :  { %852 = vmatpush3.bf16.msra.mxu1 %v970_v21 }
  0x61   :  { %853 = vmatprep.subr.bf16.mxu1 %v1155_v1 }
  0x62   :  { %246 = vmatpush1.bf16.msra.mxu0 %v954_v16 }
  0x63   :  { %247 = vmatprep.subr.bf16.mxu0 %v955_v17 }
  0x64   :  { %854 = vmatpush3.bf16.msra.mxu1 %v972_v29  ;;  %v806_v29 = vld [vmem:[%s1316_s9] ss:$0 sm:$0xff] }
  0x65   :  { %855 = vmatprep.subr.bf16.mxu1 %v1155_v1 }
  0x66   :  { %248 = vmatpush1.bf16.msra.mxu0 %v957_v18 }
  0x67   :  { %249 = vmatprep.subr.bf16.mxu0 %v958_v20 }
  0x68   :  { %856 = vmatpush3.bf16.msra.mxu1 %v974_v31 }
  0x69   :  { %857 = vmatprep.subr.bf16.mxu1 %v1155_v1 }
  0x6a   :  { %250 = vmatpush1.bf16.msra.mxu0 %v960_v22 }
  0x6b   :  { %863 = vmatprep.subr.bf16.mxu0 %v1155_v1 }
  0x6c   :  { %858 = vmatpush3.bf16.msra.mxu1 %v976_v33 }
  0x6d   :  { %268 = vmatmul.mubr.bf16.vlgmr.msra.gmra.mxu0 %v961_v23  ;;  %883 = vmatprep.subr.bf16.mxu1 %v1155_v1 }
  0x6e   :  { %864 = vmatpush3.bf16.msra.mxu0 %v963_v24  ;;  %879 = vmatprep.mubr.msk.bf16.mxu0 %vm1156_vm0, %v1155_v1 }
  0x6f   :  { %865 = vmatprep.subr.bf16.mxu0 %v1155_v1 }
  0x72   :  { %866 = vmatpush3.bf16.msra.mxu0 %v965_v25 }
  0x73   :  { %867 = vmatprep.subr.bf16.mxu0 %v1155_v1 }
  0x76   :  { %868 = vmatpush3.bf16.msra.mxu0 %v967_v26 }
  0x77   :  { %869 = vmatprep.subr.bf16.mxu0 %v1155_v1 }
  0x7a   :  { %870 = vmatpush3.bf16.msra.mxu0 %v969_v27 }
  0x7b   :  { %871 = vmatprep.subr.bf16.mxu0 %v1155_v1 }
  0x7e   :  { %872 = vmatpush3.bf16.msra.mxu0 %v971_v28 }
  0x7f   :  { %873 = vmatprep.subr.bf16.mxu0 %v1155_v1 }
  0x82   :  { %874 = vmatpush3.bf16.msra.mxu0 %v973_v30 }
  0x83   :  { %875 = vmatprep.subr.bf16.mxu0 %v1155_v1 }
  0x86   :  { %876 = vmatpush3.bf16.msra.mxu0 %v975_v32 }
  0x87   :  { %877 = vmatprep.subr.bf16.mxu0 %v1155_v1 }
  0x8a   :  { %878 = vmatpush3.bf16.msra.mxu0 %v977_v34 }
  0x8b   :  { %903 = vmatprep.subr.bf16.mxu0 %v1155_v1 }
 0x12d   :  { %v269_v41 = vpop.f32.mrf.mxu0 }
 0x12e   :  { %v270_v44 = vadd.f32 %v269_v41, %v142_v40 }
 0x12f   :  { %v271_v43 = vpop.f32.mrf.mxu0 }
 0x130   :  { %v272_v46 = vadd.f32 %v271_v43, %v146_v42  ;;  %v278_v49 = vmax.f32 %v270_v44, 0.0 }
 0x131   :  { %v273_v45 = vpop.f32.mrf.mxu0 }
 0x132   :  { %v274_v47 = vadd.f32 %v273_v45, %v142_v40  ;;  %v279_v53 = vmax.f32 %v272_v46, 0.0 }
 0x133   :  { %v275_v48 = vpop.f32.mrf.mxu0 }
 0x134   :  { %v280_v50 = vmax.f32 %v274_v47, 0.0  ;;  %v276_v51 = vadd.f32 %v275_v48, %v146_v42 }
 0x136   :  { %v282_v54 = vpack.c.bf16 %v280_v50, %v278_v49  ;;  %v281_v55 = vmax.f32 %v276_v51, 0.0 }
 0x138   :  { %v283_v57 = vpack.c.bf16 %v281_v55, %v279_v53  ;;  %860 = vmatmul.mubr.bf16.vlgmr.msra.gmra.mxu1 %v282_v54 }
 0x139   :  { %884 = vmatpush3.bf16.msra.mxu1 %v979_v52  ;;  %899 = vmatprep.mubr.msk.bf16.mxu1 %vm1156_vm0, %v1155_v1 }
 0x13a   :  { %880 = vmatmul.mubr.bf16.vlgmr.msra.gmra.mxu0 %v283_v57  ;;  %885 = vmatprep.subr.bf16.mxu1 %v1155_v1 }
 0x13b   :  { %904 = vmatpush3.bf16.msra.mxu0 %v978_v56  ;;  %919 = vmatprep.mubr.msk.bf16.mxu0 %vm1156_vm0, %v1155_v1 }
 0x13c   :  { %905 = vmatprep.subr.bf16.mxu0 %v1155_v1 }
 0x13d   :  { %886 = vmatpush3.bf16.msra.mxu1 %v981_v58 }
 0x13e   :  { %887 = vmatprep.subr.bf16.mxu1 %v1155_v1 }
 0x13f   :  { %906 = vmatpush3.bf16.msra.mxu0 %v980_v59 }
 0x140   :  { %907 = vmatprep.subr.bf16.mxu0 %v1155_v1 }
 0x141   :  { %888 = vmatpush3.bf16.msra.mxu1 %v983_v60 }
 0x142   :  { %889 = vmatprep.subr.bf16.mxu1 %v1155_v1 }
 0x143   :  { %908 = vmatpush3.bf16.msra.mxu0 %v982_v61 }
 0x144   :  { %909 = vmatprep.subr.bf16.mxu0 %v1155_v1 }
 0x145   :  { %890 = vmatpush3.bf16.msra.mxu1 %v985_v62 }
 0x146   :  { %891 = vmatprep.subr.bf16.mxu1 %v1155_v1 }
 0x147   :  { %910 = vmatpush3.bf16.msra.mxu0 %v984_v63 }
 0x148   :  { %911 = vmatprep.subr.bf16.mxu0 %v1155_v1 }
 0x149   :  { %892 = vmatpush3.bf16.msra.mxu1 %v987_v0 }
 0x14a   :  { %893 = vmatprep.subr.bf16.mxu1 %v1155_v1 }
 0x14b   :  { %912 = vmatpush3.bf16.msra.mxu0 %v986_v2 }
 0x14c   :  { %913 = vmatprep.subr.bf16.mxu0 %v1155_v1 }
 0x14d   :  { %894 = vmatpush3.bf16.msra.mxu1 %v989_v4 }
 0x14e   :  { %895 = vmatprep.subr.bf16.mxu1 %v1155_v1 }
 0x14f   :  { %914 = vmatpush3.bf16.msra.mxu0 %v988_v3 }
 0x150   :  { %915 = vmatprep.subr.bf16.mxu0 %v1155_v1 }
 0x151   :  { %896 = vmatpush3.bf16.msra.mxu1 %v991_v6 }
 0x152   :  { %897 = vmatprep.subr.bf16.mxu1 %v1155_v1 }
 0x153   :  { %916 = vmatpush3.bf16.msra.mxu0 %v990_v5 }
 0x154   :  { %917 = vmatprep.subr.bf16.mxu0 %v1155_v1 }
 0x155   :  { %898 = vmatpush3.bf16.msra.mxu1 %v993_v8 }
 0x157   :  { %918 = vmatpush3.bf16.msra.mxu0 %v992_v7 }
 0x1f8   :  { %v406_v10 = vpop.f32.mrf.mxu1 }
 0x1f9   :  { %v407_v14 = vadd.f32 %v772_v9, %v406_v10 }
 0x1fa   :  { %v861_v11 = vpop.f32.mrf.mxu1  ;;  %v504_v13 = vpop.f32.mrf.mxu0 }
 0x1fb   :  { %v505_v17 = vadd.f32 %v781_v12, %v504_v13  ;;  %v413_v20 = vmax.f32 %v407_v14, 0.0 }
 0x1fc   :  { %v409_v15 = vpop.f32.mrf.mxu1  ;;  %v881_v16 = vpop.f32.mrf.mxu0 }
 0x1fd   :  { %v410_v18 = vadd.f32 %v772_v9, %v409_v15  ;;  %v511_v24 = vmax.f32 %v505_v17, 0.0 }
 0x1fe   :  { %v862_v1 = vpop.f32.mrf.mxu1  ;;  %v507_v19 = vpop.f32.mrf.mxu0 }
 0x1ff   :  { %v414_v21 = vmax.f32 %v410_v18, 0.0  ;;  %v508_v22 = vadd.f32 %v781_v12, %v507_v19 }
 0x200   :  { %v882_v23 = vpop.f32.mrf.mxu0 }
 0x201   :  { %v415_v25 = vpack.c.bf16 %v414_v21, %v413_v20  ;;  %v512_v26 = vmax.f32 %v508_v22, 0.0 }
 0x203   :  { %v513_v27 = vpack.c.bf16 %v512_v26, %v511_v24  ;;  %920 = vmatmul.mubr.bf16.vlgmr.msra.gmra.mxu0 %v415_v25 }
 0x205   :  { %900 = vmatmul.mubr.bf16.vlgmr.msra.gmra.mxu1 %v513_v27 }
 0x2c3   :  { %v718_v28 = vpop.f32.mrf.mxu0 }
 0x2c5   :  { %v629_v30 = vpop.f32.mrf.mxu1  ;;  %v921_v31 = vpop.f32.mrf.mxu0 }
 0x2c6   :  { %v719_v32 = vadd.f32 %v718_v28, %v629_v30 }
 0x2c7   :  { %v901_v33 = vpop.f32.mrf.mxu1  ;;  %v721_v34 = vpop.f32.mrf.mxu0 }
 0x2c8   :  { %v731_v35 = vadd.f32 %v806_v29, %v719_v32 }
 0x2c9   :  { %v632_v36 = vpop.f32.mrf.mxu1  ;;  %v922_v37 = vpop.f32.mrf.mxu0 }
 0x2ca   :  { %733 = vst [vmem:[#allocation13] sm:$0xff] %v731_v35  ;;  %v722_v38 = vadd.f32 %v721_v34, %v632_v36 }
 0x2cb   :  { %v902_v39 = vpop.f32.mrf.mxu1 }
 0x2cc   :  { %v732_v40 = vadd.f32 %v806_v29, %v722_v38 }
 0x2ce   :  { %734 = vst [vmem:[#allocation13 + $0x8] sm:$0xff] %v732_v40 }
 0x2cf   :  { %1125 = shalt.err (!%p1122_p6)
}
 0x2d0   :  { %746 = dma.vmem_to_hbm [thread:$0]  %s741_s1, 256, %s1317_s10, [#allocation4], %s1145_s16, %s1145_s16, %s1146_s17  }
 0x2d1   :  { %1142 = dma.done.wait [#allocation4], 256  }
 0x2d2   :  { %1143 = vsyncadd [#allocation4], 4294967040 }
 0x2d3   :  { %750 = vsyncpa [#allocation3], 1 }
 0x2d4   :  { %751 = vsyncpa [#allocation6], 1 }
 0x2d5   :  { %752 = vsyncpa [#allocation9], 1 }
 0x2d6   :  { %753 = vsyncpa [#allocation12], 1 }
 0x2d7   :  { %754 = vsyncpa [#allocation4], 1 }

</bundles_post_ra>
